<compile_context>
chip_gen: v6e
topology: v6e:2x2x1
jax: 0.10.0
libtpu: 0.0.40
codegen_flags: <defaults>
</compile_context>

<pallas_src>
import functools

import numpy as np
import jax
import jax.numpy as jnp
from jax import lax
from jax.experimental import pallas as pl
from jax.experimental.pallas import tpu as pltpu


def _vmem_spec():
    return pl.BlockSpec(memory_space=pltpu.MemorySpace.VMEM)


def _roll_rows(a, s):
    """row i of result = a[(i + s) % n]  (== jnp.roll(a, -s, axis=0), static s).

    Lowered as two static sublane slices + one concat (XLU/copy path, cheap).
    The SAME helper is used for the data slab and the group mask so the
    per-row pairing stays consistent by construction.
    """
    return jnp.concatenate([a[s:, :], a[:s, :]], axis=0)


# --------------------------------------------------------------------------
# Fused kernel: LayerNorm -> (x_ln out)  +  HSIC(x_ln, z)  +  mmd_rbf(a0, a1)
# Inputs:
#   x_ref  : [N, F]   flattened (C*L) representation, row-major
#   z_ref  : [N, Zp]  treatment, zero-padded to a 128-lane multiple (no-op
#                     for its gram / squared norms)
#   m1_ref : [N, 1]   1.0 where the row belongs to MMD group "1" (== Xc)
# Outputs:
#   xln_ref : [N, F]   LayerNorm(x)
#   s_ref   : [1, 128] lane 0 = HSIC, lane 1 = MMD, rest 0
# --------------------------------------------------------------------------
def _proto_fused_kernel(x_ref, z_ref, m1_ref, xln_ref, s_ref,
                        *, sigma, p, sig, m_cnt, n_cnt):
    n, feat = x_ref.shape
    x = x_ref[...].astype(jnp.float32)

    # ---- LayerNorm over the full (C, L) slab; fresh torch LN => w=1, b=0 ----
    mu = jnp.mean(x, axis=-1, keepdims=True)
    var = jnp.mean((x - mu) ** 2, axis=-1, keepdims=True)
    x_ln = (x - mu) * lax.rsqrt(var + 1e-5)
    xln_ref[...] = x_ln.astype(xln_ref.dtype)

    # ---- HSIC(x_ln, z): two small grams, no stacked concat / cross waste ----
    z = z_ref[...].astype(jnp.float32)
    gx = lax.dot_general(x_ln, x_ln, (((1,), (1,)), ((), ())),
                         preferred_element_type=jnp.float32)        # (N, N)
    gz = lax.dot_general(z, z, (((1,), (1,)), ((), ())),
                         preferred_element_type=jnp.float32)        # (N, N)
    sqx = jnp.sum(x_ln * x_ln, axis=-1, keepdims=True)              # (N, 1)
    sqz = jnp.sum(z * z, axis=-1, keepdims=True)                    # (N, 1)

    gamma = 1.0 / (2.0 * sigma)          # verbatim torch gauss_kernel
    k = jnp.exp(-gamma * (sqx + jnp.transpose(sqx) - 2.0 * gx))     # (N, N)
    l = jnp.exp(-gamma * (sqz + jnp.transpose(sqz) - 2.0 * gz))     # (N, N)
    # trace(KH @ LH): K, L symmetric -> col-center K, row-center L, no NxN
    # transpose needed.
    kh = k - jnp.mean(k, axis=0, keepdims=True)
    lh = l - jnp.mean(l, axis=1, keepdims=True)
    hsic_v = jnp.sum(kh * lh, keepdims=True) / float((n - 1) ** 2)  # (1, 1)

    # ---- mmd_rbf: Minkowski(2.0001) kernel, each unordered pair once -------
    # For shift s in 1..N//2, row i of (x_ln - roll(x_ln, s)) is the pair
    # (i, (i+s) mod N).  Shifts 1..N//2-1 cover every unordered pair exactly
    # once; shift N/2 (even N) covers each |i-j|=N/2 pair twice -> weight 0.5.
    # The diagonal is never computed (it is exactly 1.0) and is folded in
    # analytically below.  Group weights ride the same slab, so the mask
    # reductions fuse into three scalar dot-reductions.
    m1 = m1_ref[...].astype(jnp.float32)    # (N, 1), 1.0 => group "1" (== Xc)
    m0 = 1.0 - m1

    diff_pieces, wcc_pieces, wtt_pieces, wall_pieces = [], [], [], []
    for s in range(1, n // 2 + 1):
        rx = _roll_rows(x_ln, s)                          # x[(i+s) % n]
        r1 = _roll_rows(m1, s)                            # m1[(i+s) % n]
        w = 0.5 if (2 * s == n) else 1.0                  # de-dup shift N/2
        diff_pieces.append(jnp.abs(x_ln - rx))            # (N, F)
        wcc_pieces.append(w * (m1 * r1))                  # both in group 1
        wtt_pieces.append(w * (m0 * (1.0 - r1)))          # both in group 0
        wall_pieces.append(jnp.full((n, 1), w, jnp.float32))
    diff = jnp.concatenate(diff_pieces, axis=0)           # (S*N, F) lane-dense
    wcc = jnp.concatenate(wcc_pieces, axis=0)             # (S*N, 1)
    wtt = jnp.concatenate(wtt_pieces, axis=0)             # (S*N, 1)
    wall = jnp.concatenate(wall_pieces, axis=0)           # (S*N, 1)

    pnorm = 2.0001
    inv_sqrt_sig = 1.0 / float(np.sqrt(sig))

    def safe_pow(v, q):      # v >= 0 ; defines 0**q == 0 (matches torch.cdist)
        return jnp.where(v > 0.0,
                         jnp.exp(q * jnp.log(jnp.maximum(v, 1e-30))), 0.0)

    # one long EUP stream over the whole pair slab
    dist_p = jnp.sum(safe_pow(diff, pnorm), axis=-1, keepdims=True)  # (S*N, 1)
    kp = jnp.exp(-safe_pow(dist_p, 1.0 / pnorm) * inv_sqrt_sig)      # (S*N, 1)

    cc_upper = jnp.sum(kp * wcc, keepdims=True)    # sum over unordered cc pairs
    tt_upper = jnp.sum(kp * wtt, keepdims=True)    # sum over unordered tt pairs
    all_upper = jnp.sum(kp * wall, keepdims=True)  # sum over all unordered pairs
    ct_sum = all_upper - cc_upper - tt_upper       # == Kct.sum() by symmetry

    mm = float(m_cnt)   # len(Xc)  (group 1)
    nn = float(n_cnt)   # len(Xt)  (group 0)
    # torch mmd_rbf verbatim; Kcc.sum() - m == 2*cc_upper (diag exactly 1),
    # Ktt.sum() - n == 2*tt_upper.
    mmd_v = (1.0 - p) ** 2 / (mm * mm) * (2.0 * cc_upper)
    mmd_v = mmd_v + p ** 2 / (nn * nn) * (2.0 * tt_upper)
    # torch: mmd -= -2*p*(1-p)/(m*n) * Kct.sum()  (i.e. this ADDS the term)
    mmd_v = mmd_v - (-2.0 * p * (1.0 - p) / (mm * nn)) * ct_sum
    mmd_v = 4.0 * mmd_v                                              # (1, 1)

    # ---- one lane-dense scalar slab: [hsic, mmd, 0, ...] ----
    lane = lax.broadcasted_iota(jnp.int32, s_ref.shape, 1)
    s_ref[...] = (jnp.where(lane == 0, hsic_v, 0.0)
                  + jnp.where(lane == 1, mmd_v, 0.0))


# --------------------------------------------------------------------------
# get_mmd group split (host-side numpy, as in the torch code); deterministic.
# --------------------------------------------------------------------------
def get_mmd_split(z_np, seed=0):
    rng = np.random.RandomState(seed)   # torch code uses global np.random
    ids = np.zeros(z_np.shape[0])
    values, _ = np.unique(z_np, axis=0, return_counts=True)
    half = values.shape[0] // 2
    if values.shape[0] % 2 == 0:
        _id = rng.permutation(np.r_[np.zeros(half), np.ones(half)])
    else:
        _id = rng.permutation(np.r_[np.zeros(half), np.ones(half + 1)])
    for i in range(z_np.shape[0]):
        value_id = int(np.where((z_np[i] == values).all(axis=1))[0][0])
        ids[i] = float(_id[value_id])
    return ids


# --------------------------------------------------------------------------
# Proto.forward equivalent (the parts defined inside Proto itself), jitted so
# the glue ops fuse around the single pallas_call.
# --------------------------------------------------------------------------
@functools.partial(jax.jit, static_argnames=("sigma", "m_cnt", "n_cnt"))
def _forward_jit(x_rep_raw, z, m1_row, *, sigma, m_cnt, n_cnt):
    n, length, ch, _ = x_rep_raw.shape

    # x_rep.transpose(1, 2).squeeze(3) -> [N, C, L], flattened row-major
    x_rep = jnp.transpose(x_rep_raw, (0, 2, 1, 3))[..., 0]
    feat = ch * length
    x_flat = x_rep.reshape(n, feat).astype(jnp.float32)

    # zero-pad z's feature axis only to the 128-lane minimum (no-op for gram)
    dtreat = z.shape[1]
    zf = max(128, ((dtreat + 127) // 128) * 128)
    z_pad = jnp.pad(z.astype(jnp.float32), ((0, 0), (0, zf - dtreat)))

    x_ln_flat, scal = pl.pallas_call(
        functools.partial(
            _proto_fused_kernel,
            sigma=float(sigma), p=float(sigma),   # torch: mmd_rbf(a0, a1, self.sigma)
            sig=0.1, m_cnt=m_cnt, n_cnt=n_cnt),
        out_shape=(jax.ShapeDtypeStruct((n, feat), jnp.float32),
                   jax.ShapeDtypeStruct((1, 128), jnp.float32)),
        in_specs=[_vmem_spec()] * 3,
        out_specs=(_vmem_spec(), _vmem_spec()),
        compiler_params=pltpu.CompilerParams(
            vmem_limit_bytes=32 * 1024 * 1024),   # fits v5e/v6e/v7x scoped VMEM
    )(x_flat, z_pad, m1_row)

    hsic_val = scal[0, 0]
    mmd_val = scal[0, 1]

    x_rep_ln = x_ln_flat.reshape(n, ch, length)

    # z_rep = z.unsqueeze(2).repeat([1, 1, L]); xz_rep = cat([x_rep, z_rep], 1)
    z_rep = jnp.repeat(z[:, :, None], length, axis=2)
    xz_rep = jnp.concatenate([x_rep_ln, z_rep], axis=1)

    # TODO(synk): y_hat, _ = self.gcn(self.A, xz_rep) and self.repnet are
    # submodules Proto never defines (they live in subclasses), so y_hat is
    # not produced here.
    return xz_rep, hsic_val, mmd_val, x_rep_ln, z


def proto_forward(x_rep_raw, z, adj, sigma, group_ids):
    del adj  # only consumed by self.gcn (subclass-defined), see TODO above
    n = x_rep_raw.shape[0]
    assert n >= 2
    gid = np.asarray(group_ids, dtype=np.float32).reshape(n)
    m_cnt = int(np.sum(gid == 1.0))   # len(a1) == Xc
    n_cnt = n - m_cnt                 # len(a0) == Xt
    assert m_cnt > 0 and n_cnt > 0, "get_mmd split produced an empty group"
    m1_row = jnp.asarray(gid.reshape(n, 1))
    return _forward_jit(x_rep_raw, z, m1_row,
                        sigma=float(sigma), m_cnt=m_cnt, n_cnt=n_cnt)


if __name__ == "__main__":
    key = jax.random.PRNGKey(0)
    k1, k2, k3 = jax.random.split(key, 3)

    N, L, C, DTREAT = 8, 8, 16, 9     # C * L = 128 lanes
    SIGMA = 1.0

    # x_rep_raw stands in for the concatenated repnet output of data2xrep
    # (repnet itself is a subclass-defined submodule -> synthesized input).
    x_rep_raw = jax.random.normal(k1, (N, L, C, 1), dtype=jnp.float32)
    z = jax.random.normal(k2, (N, DTREAT), dtype=jnp.float32)
    A = jax.random.normal(k3, (L, L), dtype=jnp.float32)  # adjacency, gcn-only

    # The MMD group split depends only on z; compute it on the host BEFORE the
    # forward so no device sync sits in the middle of the compute path.
    group_ids = get_mmd_split(np.asarray(jax.device_get(z)))

    outs = proto_forward(x_rep_raw, z, A, SIGMA, group_ids)
    jax.block_until_ready(outs)
    print("KERNEL_OK")
</pallas_src>

<mosaic_0001>
module attributes {stable_mosaic.version = 11 : i64} {
  func.func @_proto_fused_kernel(%arg0: memref<8x128xf32, #tpu.memory_space<vmem>>, %arg1: memref<8x128xf32, #tpu.memory_space<vmem>>, %arg2: memref<8x1xf32, #tpu.memory_space<vmem>>, %arg3: memref<8x128xf32, #tpu.memory_space<vmem>>, %arg4: memref<1x128xf32, #tpu.memory_space<vmem>>) attributes {dimension_semantics = [], scalar_prefetch = 0 : i64, scratch_operands = 0 : i64, tpu.core_type = #tpu.core_type<tc>} {
    %c0 = arith.constant 0 : index
    %c0_0 = arith.constant 0 : index
    %0 = vector.load %arg0[%c0, %c0_0] : memref<8x128xf32, #tpu.memory_space<vmem>>, vector<8x128xf32>
    %cst = arith.constant dense<0.000000e+00> : vector<8xf32>
    %1 = vector.multi_reduction <add>, %0, %cst [1] : vector<8x128xf32> to vector<8xf32>
    %2 = vector.shape_cast %1 : vector<8xf32> to vector<8x1xf32>
    %cst_1 = arith.constant 1.280000e+02 : f32
    %3 = vector.broadcast %cst_1 : f32 to vector<8x1xf32>
    %4 = arith.divf %2, %3 : vector<8x1xf32>
    %5 = vector.broadcast %4 : vector<8x1xf32> to vector<8x128xf32>
    %6 = arith.subf %0, %5 : vector<8x128xf32>
    %7 = arith.mulf %6, %6 : vector<8x128xf32>
    %cst_2 = arith.constant dense<0.000000e+00> : vector<8xf32>
    %8 = vector.multi_reduction <add>, %7, %cst_2 [1] : vector<8x128xf32> to vector<8xf32>
    %9 = vector.shape_cast %8 : vector<8xf32> to vector<8x1xf32>
    %cst_3 = arith.constant 1.280000e+02 : f32
    %10 = vector.broadcast %cst_3 : f32 to vector<8x1xf32>
    %11 = arith.divf %9, %10 : vector<8x1xf32>
    %12 = vector.broadcast %4 : vector<8x1xf32> to vector<8x128xf32>
    %13 = arith.subf %0, %12 : vector<8x128xf32>
    %cst_4 = arith.constant 9.99999974E-6 : f32
    %14 = vector.broadcast %cst_4 : f32 to vector<8x1xf32>
    %15 = arith.addf %11, %14 : vector<8x1xf32>
    %16 = math.rsqrt %15 : vector<8x1xf32>
    %17 = vector.broadcast %16 : vector<8x1xf32> to vector<8x128xf32>
    %18 = arith.mulf %13, %17 : vector<8x128xf32>
    %c0_5 = arith.constant 0 : index
    %c0_6 = arith.constant 0 : index
    %19 = vector.load %arg3[%c0_5, %c0_6] : memref<8x128xf32, #tpu.memory_space<vmem>>, vector<8x128xf32>
    tpu.vector_store %arg3[%c0_5, %c0_6], %18 {strides = array<i32>} : memref<8x128xf32, #tpu.memory_space<vmem>>, vector<8x128xf32>,
    %c0_7 = arith.constant 0 : index
    %c0_8 = arith.constant 0 : index
    %20 = vector.load %arg1[%c0_7, %c0_8] : memref<8x128xf32, #tpu.memory_space<vmem>>, vector<8x128xf32>
    %cst_9 = arith.constant dense<0.000000e+00> : vector<8x8xf32>
    %21 = tpu.matmul %18, %18, %cst_9 {dimension_numbers = #tpu.dot_dimension_numbers<[1], [1], [0], [0], [0, 0, 1, 0], [], []>} : vector<8x128xf32>, vector<8x128xf32>, vector<8x8xf32> -> vector<8x8xf32>
    %cst_10 = arith.constant dense<0.000000e+00> : vector<8x8xf32>
    %22 = tpu.matmul %20, %20, %cst_10 {dimension_numbers = #tpu.dot_dimension_numbers<[1], [1], [0], [0], [0, 0, 1, 0], [], []>} : vector<8x128xf32>, vector<8x128xf32>, vector<8x8xf32> -> vector<8x8xf32>
    %23 = arith.mulf %18, %18 : vector<8x128xf32>
    %cst_11 = arith.constant dense<0.000000e+00> : vector<8xf32>
    %24 = vector.multi_reduction <add>, %23, %cst_11 [1] : vector<8x128xf32> to vector<8xf32>
    %25 = vector.shape_cast %24 : vector<8xf32> to vector<8x1xf32>
    %26 = arith.mulf %20, %20 : vector<8x128xf32>
    %cst_12 = arith.constant dense<0.000000e+00> : vector<8xf32>
    %27 = vector.multi_reduction <add>, %26, %cst_12 [1] : vector<8x128xf32> to vector<8xf32>
    %28 = vector.shape_cast %27 : vector<8xf32> to vector<8x1xf32>
    %29 = tpu.transpose %25, [1, 0] : vector<8x1xf32> -> vector<1x8xf32>
    %30 = vector.broadcast %25 : vector<8x1xf32> to vector<8x8xf32>
    %31 = vector.broadcast %29 : vector<1x8xf32> to vector<8x8xf32>
    %32 = arith.addf %30, %31 : vector<8x8xf32>
    %cst_13 = arith.constant 2.000000e+00 : f32
    %33 = vector.broadcast %cst_13 : f32 to vector<8x8xf32>
    %34 = arith.mulf %33, %21 : vector<8x8xf32>
    %35 = arith.subf %32, %34 : vector<8x8xf32>
    %cst_14 = arith.constant -5.000000e-01 : f32
    %36 = vector.broadcast %cst_14 : f32 to vector<8x8xf32>
    %37 = arith.mulf %36, %35 : vector<8x8xf32>
    %38 = math.exp %37 : vector<8x8xf32>
    %39 = tpu.transpose %28, [1, 0] : vector<8x1xf32> -> vector<1x8xf32>
    %40 = vector.broadcast %28 : vector<8x1xf32> to vector<8x8xf32>
    %41 = vector.broadcast %39 : vector<1x8xf32> to vector<8x8xf32>
    %42 = arith.addf %40, %41 : vector<8x8xf32>
    %cst_15 = arith.constant 2.000000e+00 : f32
    %43 = vector.broadcast %cst_15 : f32 to vector<8x8xf32>
    %44 = arith.mulf %43, %22 : vector<8x8xf32>
    %45 = arith.subf %42, %44 : vector<8x8xf32>
    %cst_16 = arith.constant -5.000000e-01 : f32
    %46 = vector.broadcast %cst_16 : f32 to vector<8x8xf32>
    %47 = arith.mulf %46, %45 : vector<8x8xf32>
    %48 = math.exp %47 : vector<8x8xf32>
    %cst_17 = arith.constant dense<0.000000e+00> : vector<8xf32>
    %49 = vector.multi_reduction <add>, %38, %cst_17 [0] : vector<8x8xf32> to vector<8xf32>
    %50 = vector.shape_cast %49 : vector<8xf32> to vector<1x8xf32>
    %cst_18 = arith.constant 8.000000e+00 : f32
    %51 = vector.broadcast %cst_18 : f32 to vector<1x8xf32>
    %52 = arith.divf %50, %51 : vector<1x8xf32>
    %53 = vector.broadcast %52 : vector<1x8xf32> to vector<8x8xf32>
    %54 = arith.subf %38, %53 : vector<8x8xf32>
    %cst_19 = arith.constant dense<0.000000e+00> : vector<8xf32>
    %55 = vector.multi_reduction <add>, %48, %cst_19 [1] : vector<8x8xf32> to vector<8xf32>
    %56 = vector.shape_cast %55 : vector<8xf32> to vector<8x1xf32>
    %cst_20 = arith.constant 8.000000e+00 : f32
    %57 = vector.broadcast %cst_20 : f32 to vector<8x1xf32>
    %58 = arith.divf %56, %57 : vector<8x1xf32>
    %59 = vector.broadcast %58 : vector<8x1xf32> to vector<8x8xf32>
    %60 = arith.subf %48, %59 : vector<8x8xf32>
    %61 = arith.mulf %54, %60 : vector<8x8xf32>
    %62 = vector.shape_cast %61 : vector<8x8xf32> to vector<1x8x8xf32>
    %cst_21 = arith.constant dense<0.000000e+00> : vector<1xf32>
    %63 = vector.multi_reduction <add>, %62, %cst_21 [1, 2] : vector<1x8x8xf32> to vector<1xf32>
    %64 = vector.shape_cast %63 : vector<1xf32> to vector<1x1x1xf32>
    %65 = vector.extract %64[0, 0, 0] : f32 from vector<1x1x1xf32>
    %66 = vector.broadcast %65 : f32 to vector<1x1xf32>
    %cst_22 = arith.constant 4.900000e+01 : f32
    %67 = vector.broadcast %cst_22 : f32 to vector<1x1xf32>
    %68 = arith.divf %66, %67 : vector<1x1xf32>
    %c0_23 = arith.constant 0 : index
    %c0_24 = arith.constant 0 : index
    %69 = vector.load %arg2[%c0_23, %c0_24] : memref<8x1xf32, #tpu.memory_space<vmem>>, vector<8x1xf32>
    %cst_25 = arith.constant 1.000000e+00 : f32
    %70 = vector.broadcast %cst_25 : f32 to vector<8x1xf32>
    %71 = arith.subf %70, %69 : vector<8x1xf32>
    %72 = vector.extract_strided_slice %18 {offsets = [1, 0], sizes = [7, 128], strides = [1, 1]} : vector<8x128xf32> to vector<7x128xf32>
    %73 = vector.extract_strided_slice %18 {offsets = [0, 0], sizes = [1, 128], strides = [1, 1]} : vector<8x128xf32> to vector<1x128xf32>
    %74 = tpu.concatenate %72, %73 in 0 : vector<7x128xf32>, vector<1x128xf32> -> vector<8x128xf32>
    %75 = vector.extract_strided_slice %69 {offsets = [1, 0], sizes = [7, 1], strides = [1, 1]} : vector<8x1xf32> to vector<7x1xf32>
    %76 = vector.extract_strided_slice %69 {offsets = [0, 0], sizes = [1, 1], strides = [1, 1]} : vector<8x1xf32> to vector<1x1xf32>
    %77 = tpu.concatenate %75, %76 in 0 : vector<7x1xf32>, vector<1x1xf32> -> vector<8x1xf32>
    %78 = arith.subf %18, %74 : vector<8x128xf32>
    %79 = math.absf %78 : vector<8x128xf32>
    %80 = arith.mulf %69, %77 : vector<8x1xf32>
    %cst_26 = arith.constant 1.000000e+00 : f32
    %81 = vector.broadcast %cst_26 : f32 to vector<8x1xf32>
    %82 = arith.mulf %81, %80 : vector<8x1xf32>
    %cst_27 = arith.constant 1.000000e+00 : f32
    %83 = vector.broadcast %cst_27 : f32 to vector<8x1xf32>
    %84 = arith.subf %83, %77 : vector<8x1xf32>
    %85 = arith.mulf %71, %84 : vector<8x1xf32>
    %cst_28 = arith.constant 1.000000e+00 : f32
    %86 = vector.broadcast %cst_28 : f32 to vector<8x1xf32>
    %87 = arith.mulf %86, %85 : vector<8x1xf32>
    %cst_29 = arith.constant 1.000000e+00 : f32
    %88 = vector.broadcast %cst_29 : f32 to vector<8x1xf32>
    %89 = vector.extract_strided_slice %18 {offsets = [2, 0], sizes = [6, 128], strides = [1, 1]} : vector<8x128xf32> to vector<6x128xf32>
    %90 = vector.extract_strided_slice %18 {offsets = [0, 0], sizes = [2, 128], strides = [1, 1]} : vector<8x128xf32> to vector<2x128xf32>
    %91 = tpu.concatenate %89, %90 in 0 : vector<6x128xf32>, vector<2x128xf32> -> vector<8x128xf32>
    %92 = vector.extract_strided_slice %69 {offsets = [2, 0], sizes = [6, 1], strides = [1, 1]} : vector<8x1xf32> to vector<6x1xf32>
    %93 = vector.extract_strided_slice %69 {offsets = [0, 0], sizes = [2, 1], strides = [1, 1]} : vector<8x1xf32> to vector<2x1xf32>
    %94 = tpu.concatenate %92, %93 in 0 : vector<6x1xf32>, vector<2x1xf32> -> vector<8x1xf32>
    %95 = arith.subf %18, %91 : vector<8x128xf32>
    %96 = math.absf %95 : vector<8x128xf32>
    %97 = arith.mulf %69, %94 : vector<8x1xf32>
    %cst_30 = arith.constant 1.000000e+00 : f32
    %98 = vector.broadcast %cst_30 : f32 to vector<8x1xf32>
    %99 = arith.mulf %98, %97 : vector<8x1xf32>
    %cst_31 = arith.constant 1.000000e+00 : f32
    %100 = vector.broadcast %cst_31 : f32 to vector<8x1xf32>
    %101 = arith.subf %100, %94 : vector<8x1xf32>
    %102 = arith.mulf %71, %101 : vector<8x1xf32>
    %cst_32 = arith.constant 1.000000e+00 : f32
    %103 = vector.broadcast %cst_32 : f32 to vector<8x1xf32>
    %104 = arith.mulf %103, %102 : vector<8x1xf32>
    %cst_33 = arith.constant 1.000000e+00 : f32
    %105 = vector.broadcast %cst_33 : f32 to vector<8x1xf32>
    %106 = vector.extract_strided_slice %18 {offsets = [3, 0], sizes = [5, 128], strides = [1, 1]} : vector<8x128xf32> to vector<5x128xf32>
    %107 = vector.extract_strided_slice %18 {offsets = [0, 0], sizes = [3, 128], strides = [1, 1]} : vector<8x128xf32> to vector<3x128xf32>
    %108 = tpu.concatenate %106, %107 in 0 : vector<5x128xf32>, vector<3x128xf32> -> vector<8x128xf32>
    %109 = vector.extract_strided_slice %69 {offsets = [3, 0], sizes = [5, 1], strides = [1, 1]} : vector<8x1xf32> to vector<5x1xf32>
    %110 = vector.extract_strided_slice %69 {offsets = [0, 0], sizes = [3, 1], strides = [1, 1]} : vector<8x1xf32> to vector<3x1xf32>
    %111 = tpu.concatenate %109, %110 in 0 : vector<5x1xf32>, vector<3x1xf32> -> vector<8x1xf32>
    %112 = arith.subf %18, %108 : vector<8x128xf32>
    %113 = math.absf %112 : vector<8x128xf32>
    %114 = arith.mulf %69, %111 : vector<8x1xf32>
    %cst_34 = arith.constant 1.000000e+00 : f32
    %115 = vector.broadcast %cst_34 : f32 to vector<8x1xf32>
    %116 = arith.mulf %115, %114 : vector<8x1xf32>
    %cst_35 = arith.constant 1.000000e+00 : f32
    %117 = vector.broadcast %cst_35 : f32 to vector<8x1xf32>
    %118 = arith.subf %117, %111 : vector<8x1xf32>
    %119 = arith.mulf %71, %118 : vector<8x1xf32>
    %cst_36 = arith.constant 1.000000e+00 : f32
    %120 = vector.broadcast %cst_36 : f32 to vector<8x1xf32>
    %121 = arith.mulf %120, %119 : vector<8x1xf32>
    %cst_37 = arith.constant 1.000000e+00 : f32
    %122 = vector.broadcast %cst_37 : f32 to vector<8x1xf32>
    %123 = vector.extract_strided_slice %18 {offsets = [4, 0], sizes = [4, 128], strides = [1, 1]} : vector<8x128xf32> to vector<4x128xf32>
    %124 = vector.extract_strided_slice %18 {offsets = [0, 0], sizes = [4, 128], strides = [1, 1]} : vector<8x128xf32> to vector<4x128xf32>
    %125 = tpu.concatenate %123, %124 in 0 : vector<4x128xf32>, vector<4x128xf32> -> vector<8x128xf32>
    %126 = vector.extract_strided_slice %69 {offsets = [4, 0], sizes = [4, 1], strides = [1, 1]} : vector<8x1xf32> to vector<4x1xf32>
    %127 = vector.extract_strided_slice %69 {offsets = [0, 0], sizes = [4, 1], strides = [1, 1]} : vector<8x1xf32> to vector<4x1xf32>
    %128 = tpu.concatenate %126, %127 in 0 : vector<4x1xf32>, vector<4x1xf32> -> vector<8x1xf32>
    %129 = arith.subf %18, %125 : vector<8x128xf32>
    %130 = math.absf %129 : vector<8x128xf32>
    %131 = arith.mulf %69, %128 : vector<8x1xf32>
    %cst_38 = arith.constant 5.000000e-01 : f32
    %132 = vector.broadcast %cst_38 : f32 to vector<8x1xf32>
    %133 = arith.mulf %132, %131 : vector<8x1xf32>
    %cst_39 = arith.constant 1.000000e+00 : f32
    %134 = vector.broadcast %cst_39 : f32 to vector<8x1xf32>
    %135 = arith.subf %134, %128 : vector<8x1xf32>
    %136 = arith.mulf %71, %135 : vector<8x1xf32>
    %cst_40 = arith.constant 5.000000e-01 : f32
    %137 = vector.broadcast %cst_40 : f32 to vector<8x1xf32>
    %138 = arith.mulf %137, %136 : vector<8x1xf32>
    %cst_41 = arith.constant 5.000000e-01 : f32
    %139 = vector.broadcast %cst_41 : f32 to vector<8x1xf32>
    %140 = tpu.concatenate %79, %96, %113, %130 in 0 : vector<8x128xf32>, vector<8x128xf32>, vector<8x128xf32>, vector<8x128xf32> -> vector<32x128xf32>
    %141 = tpu.concatenate %82, %99, %116, %133 in 0 : vector<8x1xf32>, vector<8x1xf32>, vector<8x1xf32>, vector<8x1xf32> -> vector<32x1xf32>
    %142 = tpu.concatenate %87, %104, %121, %138 in 0 : vector<8x1xf32>, vector<8x1xf32>, vector<8x1xf32>, vector<8x1xf32> -> vector<32x1xf32>
    %143 = tpu.concatenate %88, %105, %122, %139 in 0 : vector<8x1xf32>, vector<8x1xf32>, vector<8x1xf32>, vector<8x1xf32> -> vector<32x1xf32>
    %cst_42 = arith.constant 0.000000e+00 : f32
    %144 = vector.broadcast %cst_42 : f32 to vector<32x128xf32>
    %145 = arith.cmpf ogt, %140, %144 : vector<32x128xf32>
    %cst_43 = arith.constant 1.000000e-30 : f32
    %146 = vector.broadcast %cst_43 : f32 to vector<32x128xf32>
    %147 = arith.maximumf %140, %146 : vector<32x128xf32>
    %148 = math.log %147 : vector<32x128xf32>
    %cst_44 = arith.constant 2.000100e+00 : f32
    %149 = vector.broadcast %cst_44 : f32 to vector<32x128xf32>
    %150 = arith.mulf %149, %148 : vector<32x128xf32>
    %151 = math.exp %150 : vector<32x128xf32>
    %cst_45 = arith.constant 0.000000e+00 : f32
    %152 = vector.broadcast %cst_45 : f32 to vector<32x128xf32>
    %153 = arith.select %145, %151, %152 : vector<32x128xi1>, vector<32x128xf32>
    %cst_46 = arith.constant dense<0.000000e+00> : vector<32xf32>
    %154 = vector.multi_reduction <add>, %153, %cst_46 [1] : vector<32x128xf32> to vector<32xf32>
    %155 = vector.shape_cast %154 : vector<32xf32> to vector<32x1xf32>
    %cst_47 = arith.constant 0.000000e+00 : f32
    %156 = vector.broadcast %cst_47 : f32 to vector<32x1xf32>
    %157 = arith.cmpf ogt, %155, %156 : vector<32x1xf32>
    %cst_48 = arith.constant 1.000000e-30 : f32
    %158 = vector.broadcast %cst_48 : f32 to vector<32x1xf32>
    %159 = arith.maximumf %155, %158 : vector<32x1xf32>
    %160 = math.log %159 : vector<32x1xf32>
    %cst_49 = arith.constant 4.999750e-01 : f32
    %161 = vector.broadcast %cst_49 : f32 to vector<32x1xf32>
    %162 = arith.mulf %161, %160 : vector<32x1xf32>
    %163 = math.exp %162 : vector<32x1xf32>
    %cst_50 = arith.constant 0.000000e+00 : f32
    %164 = vector.broadcast %cst_50 : f32 to vector<32x1xf32>
    %165 = arith.select %157, %163, %164 : vector<32x1xi1>, vector<32x1xf32>
    %cst_51 = arith.constant 0.000000e+00 : f32
    %166 = vector.broadcast %cst_51 : f32 to vector<32x1xf32>
    %167 = arith.subf %166, %165 : vector<32x1xf32>
    %cst_52 = arith.constant 3.1622777 : f32
    %168 = vector.broadcast %cst_52 : f32 to vector<32x1xf32>
    %169 = arith.mulf %167, %168 : vector<32x1xf32>
    %170 = math.exp %169 : vector<32x1xf32>
    %171 = arith.mulf %170, %141 : vector<32x1xf32>
    %172 = vector.shape_cast %171 : vector<32x1xf32> to vector<1x32x1xf32>
    %cst_53 = arith.constant dense<0.000000e+00> : vector<1xf32>
    %173 = vector.multi_reduction <add>, %172, %cst_53 [1, 2] : vector<1x32x1xf32> to vector<1xf32>
    %174 = vector.shape_cast %173 : vector<1xf32> to vector<1x1x1xf32>
    %175 = vector.extract %174[0, 0, 0] : f32 from vector<1x1x1xf32>
    %176 = vector.broadcast %175 : f32 to vector<1x1xf32>
    %177 = arith.mulf %170, %142 : vector<32x1xf32>
    %178 = vector.shape_cast %177 : vector<32x1xf32> to vector<1x32x1xf32>
    %cst_54 = arith.constant dense<0.000000e+00> : vector<1xf32>
    %179 = vector.multi_reduction <add>, %178, %cst_54 [1, 2] : vector<1x32x1xf32> to vector<1xf32>
    %180 = vector.shape_cast %179 : vector<1xf32> to vector<1x1x1xf32>
    %181 = vector.extract %180[0, 0, 0] : f32 from vector<1x1x1xf32>
    %182 = vector.broadcast %181 : f32 to vector<1x1xf32>
    %183 = arith.mulf %170, %143 : vector<32x1xf32>
    %184 = vector.shape_cast %183 : vector<32x1xf32> to vector<1x32x1xf32>
    %cst_55 = arith.constant dense<0.000000e+00> : vector<1xf32>
    %185 = vector.multi_reduction <add>, %184, %cst_55 [1, 2] : vector<1x32x1xf32> to vector<1xf32>
    %186 = vector.shape_cast %185 : vector<1xf32> to vector<1x1x1xf32>
    %187 = vector.extract %186[0, 0, 0] : f32 from vector<1x1x1xf32>
    %188 = vector.broadcast %187 : f32 to vector<1x1xf32>
    %189 = arith.subf %188, %176 : vector<1x1xf32>
    %190 = arith.subf %189, %182 : vector<1x1xf32>
    %cst_56 = arith.constant 2.000000e+00 : f32
    %191 = vector.broadcast %cst_56 : f32 to vector<1x1xf32>
    %192 = arith.mulf %191, %176 : vector<1x1xf32>
    %cst_57 = arith.constant 0.000000e+00 : f32
    %193 = vector.broadcast %cst_57 : f32 to vector<1x1xf32>
    %194 = arith.mulf %193, %192 : vector<1x1xf32>
    %cst_58 = arith.constant 2.000000e+00 : f32
    %195 = vector.broadcast %cst_58 : f32 to vector<1x1xf32>
    %196 = arith.mulf %195, %182 : vector<1x1xf32>
    %cst_59 = arith.constant 6.250000e-02 : f32
    %197 = vector.broadcast %cst_59 : f32 to vector<1x1xf32>
    %198 = arith.mulf %197, %196 : vector<1x1xf32>
    %199 = arith.addf %194, %198 : vector<1x1xf32>
    %cst_60 = arith.constant -0.000000e+00 : f32
    %200 = vector.broadcast %cst_60 : f32 to vector<1x1xf32>
    %201 = arith.mulf %200, %190 : vector<1x1xf32>
    %202 = arith.subf %199, %201 : vector<1x1xf32>
    %cst_61 = arith.constant 4.000000e+00 : f32
    %203 = vector.broadcast %cst_61 : f32 to vector<1x1xf32>
    %204 = arith.mulf %203, %202 : vector<1x1xf32>
    %205 = tpu.iota {dimensions = array<i32: 1>} : vector<1x128xi32>
    %c0_i32 = arith.constant 0 : i32
    %206 = vector.broadcast %c0_i32 : i32 to vector<1x128xi32>
    %207 = arith.cmpi eq, %205, %206 : vector<1x128xi32>
    %cst_62 = arith.constant 0.000000e+00 : f32
    %208 = vector.shape_cast %68 : vector<1x1xf32> to vector<1x1xf32>
    %209 = vector.broadcast %208 : vector<1x1xf32> to vector<1x128xf32>
    %210 = vector.broadcast %cst_62 : f32 to vector<1x128xf32>
    %211 = arith.select %207, %209, %210 : vector<1x128xi1>, vector<1x128xf32>
    %c1_i32 = arith.constant 1 : i32
    %212 = vector.broadcast %c1_i32 : i32 to vector<1x128xi32>
    %213 = arith.cmpi eq, %205, %212 : vector<1x128xi32>
    %cst_63 = arith.constant 0.000000e+00 : f32
    %214 = vector.shape_cast %204 : vector<1x1xf32> to vector<1x1xf32>
    %215 = vector.broadcast %214 : vector<1x1xf32> to vector<1x128xf32>
    %216 = vector.broadcast %cst_63 : f32 to vector<1x128xf32>
    %217 = arith.select %213, %215, %216 : vector<1x128xi1>, vector<1x128xf32>
    %218 = arith.addf %211, %217 : vector<1x128xf32>
    %c0_64 = arith.constant 0 : index
    %c0_65 = arith.constant 0 : index
    %219 = vector.load %arg4[%c0_64, %c0_65] : memref<1x128xf32, #tpu.memory_space<vmem>>, vector<1x128xf32>
    tpu.vector_store %arg4[%c0_64, %c0_65], %218 {strides = array<i32>} : memref<1x128xf32, #tpu.memory_space<vmem>>, vector<1x128xf32>,
    return
  }
}

</mosaic_0001>

<bundles_post_ra>
// kernel: squeeze.3
= control target key start
LH: loop header
LB: loop body
LE: loop exit
PB: predicated region body
PF: predicated region fallthrough
CT: control target
= control target key end

     0   :  { %vm6_vm0 = vcmask 1043458   ;;  %vm10_vm1 = vcmask 1045508   ;;  %vm14_vm2 = vcmask 1047558   ;;  %s19_s6 = smov 3  ;;  %s22_s7 = smov 12  ;;  %vm16_vm3 = vcmask 64512   ;;  %s736_s0 = inlined_call_operand.vmem [shape: f32[8,16,8,1], index: 0, kind: input, shape index: {}]   ;;  %s737_s1 = inlined_call_operand.vmem [shape: f32[8,128], index: 1, kind: output, shape index: {}]  }
   0x1   :  { %v348_v0 = vld [vmem:[%s736_s0 + $0xf] ss:$16 sm:%s19_s6]   ;;  %s27_s12 = smov 48  ;;  %s32_s13 = smov 192  ;;  %vm38_vm4 = vcmask 1048512   ;;  %vm60_vm5 = vcmask 982912  }
   0x2   :  { %v349_v1 = vld [vmem:[%s736_s0 + $0xf] ss:$16 sm:%s22_s7]   ;;  %s63_s18 = smov 3  ;;  %s66_s21 = smov 12  ;;  %vm82_vm6 = vcmask 917312   ;;  %vm104_vm7 = vcmask 851712  }
   0x3   :  { %v25_v2 = vsel %vm6_vm0, %v349_v1, %v348_v0  ;;  %v350_v3 = vld [vmem:[%s736_s0 + $0xf] ss:$16 sm:%s27_s12]   ;;  %v356_v6 = vld [vmem:[%s736_s0 + $0xd] ss:$16 sm:%s63_s18]   ;;  %s71_s22 = smov 48  ;;  %s76_s27 = smov 192 }
   0x4   :  { %v351_v4 = vld [vmem:[%s736_s0 + $0xf] ss:$16 sm:%s32_s13]   ;;  %v30_v5 = vsel %vm10_vm1, %v350_v3, %v25_v2  ;;  %v357_v8 = vld [vmem:[%s736_s0 + $0xd] ss:$16 sm:%s66_s21]   ;;  %s423_s28 = smov 120   ;;  %s41_s2 = smov 3 }
   0x5   :  { %v35_v7 = vsel %vm14_vm2, %v351_v4, %v30_v5  ;;  %v358_v9 = vld [vmem:[%s736_s0 + $0xd] ss:$16 sm:%s71_s22]   ;;  %v69_v10 = vsel %vm6_vm0, %v357_v8, %v356_v6  ;;  %s44_s3 = smov 12  ;;  %v352_v13 = vld [vmem:[%s736_s0 + $0xe] ss:$16 sm:%s41_s2]   ;;  %s49_s8 = smov 48 }
   0x6   :  { %36 = vrot.lane.b32.xlu0 %v35_v7, %s423_s28  ;;  %v359_v11 = vld [vmem:[%s736_s0 + $0xd] ss:$16 sm:%s76_s27]   ;;  %v74_v12 = vsel %vm10_vm1, %v358_v9, %v69_v10  ;;  %s54_s9 = smov 192  ;;  %s85_s14 = smov 3  ;;  %vm126_vm8 = vcmask 786112   ;;  %vm148_vm9 = vcmask 720512  }
   0x7   :  { %v353_v14 = vld [vmem:[%s736_s0 + $0xe] ss:$16 sm:%s44_s3]   ;;  %v79_v15 = vsel %vm14_vm2, %v359_v11, %v74_v12  ;;  %s424_s15 = smov 104   ;;  %v360_v20 = vld [vmem:[%s736_s0 + $0xc] ss:$16 sm:%s85_s14]   ;;  %s88_s18 = smov 12 }
   0x8   :  { %v47_v16 = vsel %vm6_vm0, %v353_v14, %v352_v13  ;;  %v354_v17 = vld [vmem:[%s736_s0 + $0xe] ss:$16 sm:%s49_s8]   ;;  %80 = vrot.lane.b32.xlu1 %v79_v15, %s424_s15  ;;  %s93_s19 = smov 48  ;;  %s98_s24 = smov 192  ;;  %vm170_vm10 = vcmask 654912   ;;  %vm192_vm11 = vcmask 589312  }
   0x9   :  { %v355_v18 = vld [vmem:[%s736_s0 + $0xe] ss:$16 sm:%s54_s9]   ;;  %v52_v19 = vsel %vm10_vm1, %v354_v17, %v47_v16  ;;  %v361_v22 = vld [vmem:[%s736_s0 + $0xc] ss:$16 sm:%s88_s18]   ;;  %s425_s25 = smov 112   ;;  %s107_s28 = smov 3 }
   0xa   :  { %v57_v21 = vsel %vm14_vm2, %v355_v18, %v52_v19  ;;  %v362_v23 = vld [vmem:[%s736_s0 + $0xc] ss:$16 sm:%s93_s19]   ;;  %v91_v24 = vsel %vm6_vm0, %v361_v22, %v360_v20  ;;  %s110_s29 = smov 12  ;;  %v364_v27 = vld [vmem:[%s736_s0 + $0xb] ss:$16 sm:%s107_s28]   ;;  %s115_s5 = smov 48 }
   0xb   :  { %58 = vrot.lane.b32.xlu0 %v57_v21, %s425_s25  ;;  %v363_v25 = vld [vmem:[%s736_s0 + $0xc] ss:$16 sm:%s98_s24]   ;;  %v96_v26 = vsel %vm10_vm1, %v362_v23, %v91_v24  ;;  %s120_s6 = smov 192  ;;  %s129_s11 = smov 3  ;;  %vm214_vm12 = vcmask 523712   ;;  %vm236_vm13 = vcmask 458112  }
   0xc   :  { %v365_v28 = vld [vmem:[%s736_s0 + $0xb] ss:$16 sm:%s110_s29]   ;;  %v101_v29 = vsel %vm14_vm2, %v363_v25, %v96_v26  ;;  %s426_s12 = smov 96   ;;  %v368_v34 = vld [vmem:[%s736_s0 + $0xa] ss:$16 sm:%s129_s11]   ;;  %s132_s15 = smov 12 }
   0xd   :  { %v113_v30 = vsel %vm6_vm0, %v365_v28, %v364_v27  ;;  %v366_v31 = vld [vmem:[%s736_s0 + $0xb] ss:$16 sm:%s115_s5]   ;;  %102 = vrot.lane.b32.xlu1 %v101_v29, %s426_s12  ;;  %s137_s16 = smov 48  ;;  %s142_s21 = smov 192  ;;  %vm258_vm14 = vcmask 392512   ;;  %vm280_vm15 = vcmask 326912  }
   0xe   :  { %v367_v32 = vld [vmem:[%s736_s0 + $0xb] ss:$16 sm:%s120_s6]   ;;  %v118_v33 = vsel %vm10_vm1, %v366_v31, %v113_v30  ;;  %v369_v36 = vld [vmem:[%s736_s0 + $0xa] ss:$16 sm:%s132_s15]   ;;  %s427_s22 = smov 88   ;;  %s151_s25 = smov 3 }
   0xf   :  { %v123_v35 = vsel %vm14_vm2, %v367_v32, %v118_v33  ;;  %v370_v37 = vld [vmem:[%s736_s0 + $0xa] ss:$16 sm:%s137_s16]   ;;  %v135_v38 = vsel %vm6_vm0, %v369_v36, %v368_v34  ;;  %s154_s26 = smov 12  ;;  %v372_v41 = vld [vmem:[%s736_s0 + $0x9] ss:$16 sm:%s151_s25]   ;;  %s159_s2 = smov 48 }
  0x10   :  { %124 = vrot.lane.b32.xlu0 %v123_v35, %s427_s22  ;;  %v371_v39 = vld [vmem:[%s736_s0 + $0xa] ss:$16 sm:%s142_s21]   ;;  %v140_v40 = vsel %vm10_vm1, %v370_v37, %v135_v38  ;;  %s164_s3 = smov 192  ;;  %s173_s8 = smov 3 }
  0x11   :  { %v373_v42 = vld [vmem:[%s736_s0 + $0x9] ss:$16 sm:%s154_s26]   ;;  %v145_v43 = vsel %vm14_vm2, %v371_v39, %v140_v40  ;;  %s428_s9 = smov 80   ;;  %v376_v48 = vld [vmem:[%s736_s0 + $0x8] ss:$16 sm:%s173_s8]   ;;  %s176_s12 = smov 12 }
  0x12   :  { %v157_v44 = vsel %vm6_vm0, %v373_v42, %v372_v41  ;;  %v374_v45 = vld [vmem:[%s736_s0 + $0x9] ss:$16 sm:%s159_s2]   ;;  %146 = vrot.lane.b32.xlu1 %v145_v43, %s428_s9  ;;  %s181_s13 = smov 48  ;;  %s186_s18 = smov 192 }
  0x13   :  { %v375_v46 = vld [vmem:[%s736_s0 + $0x9] ss:$16 sm:%s164_s3]   ;;  %v162_v47 = vsel %vm10_vm1, %v374_v45, %v157_v44  ;;  %v377_v50 = vld [vmem:[%s736_s0 + $0x8] ss:$16 sm:%s176_s12]   ;;  %s429_s19 = smov 72   ;;  %s195_s22 = smov 3 }
  0x14   :  { %v167_v49 = vsel %vm14_vm2, %v375_v46, %v162_v47  ;;  %v378_v51 = vld [vmem:[%s736_s0 + $0x8] ss:$16 sm:%s181_s13]   ;;  %v179_v52 = vsel %vm6_vm0, %v377_v50, %v376_v48  ;;  %s198_s23 = smov 12  ;;  %v380_v55 = vld [vmem:[%s736_s0 + $0x7] ss:$16 sm:%s195_s22]   ;;  %s203_s28 = smov 48 }
  0x15   :  { %168 = vrot.lane.b32.xlu0 %v167_v49, %s429_s19  ;;  %v379_v53 = vld [vmem:[%s736_s0 + $0x8] ss:$16 sm:%s186_s18]   ;;  %v184_v54 = vsel %vm10_vm1, %v378_v51, %v179_v52  ;;  %s208_s29 = smov 192  ;;  %s217_s5 = smov 3 }
  0x16   :  { %v381_v56 = vld [vmem:[%s736_s0 + $0x7] ss:$16 sm:%s198_s23]   ;;  %v189_v57 = vsel %vm14_vm2, %v379_v53, %v184_v54  ;;  %s430_s6 = smov 64   ;;  %v384_v62 = vld [vmem:[%s736_s0 + $0x6] ss:$16 sm:%s217_s5]   ;;  %s220_s9 = smov 12 }
  0x17   :  { %v201_v58 = vsel %vm6_vm0, %v381_v56, %v380_v55  ;;  %v382_v59 = vld [vmem:[%s736_s0 + $0x7] ss:$16 sm:%s203_s28]   ;;  %190 = vrot.lane.b32.xlu1 %v189_v57, %s430_s6  ;;  %s225_s10 = smov 48  ;;  %s230_s15 = smov 192 }
  0x18   :  { %v383_v60 = vld [vmem:[%s736_s0 + $0x7] ss:$16 sm:%s208_s29]   ;;  %v206_v61 = vsel %vm10_vm1, %v382_v59, %v201_v58  ;;  %v385_v0 = vld [vmem:[%s736_s0 + $0x6] ss:$16 sm:%s220_s9]   ;;  %s431_s16 = smov 56   ;;  %s239_s19 = smov 3 }
  0x19   :  { %v211_v63 = vsel %vm14_vm2, %v383_v60, %v206_v61  ;;  %v386_v1 = vld [vmem:[%s736_s0 + $0x6] ss:$16 sm:%s225_s10]   ;;  %v223_v2 = vsel %vm6_vm0, %v385_v0, %v384_v62  ;;  %s242_s20 = smov 12  ;;  %v388_v5 = vld [vmem:[%s736_s0 + $0x5] ss:$16 sm:%s239_s19]   ;;  %s247_s25 = smov 48 }
  0x1a   :  { %212 = vrot.lane.b32.xlu0 %v211_v63, %s431_s16  ;;  %v387_v3 = vld [vmem:[%s736_s0 + $0x6] ss:$16 sm:%s230_s15]   ;;  %v228_v4 = vsel %vm10_vm1, %v386_v1, %v223_v2  ;;  %s252_s26 = smov 192  ;;  %s261_s2 = smov 3 }
  0x1b   :  { %v389_v6 = vld [vmem:[%s736_s0 + $0x5] ss:$16 sm:%s242_s20]   ;;  %v233_v7 = vsel %vm14_vm2, %v387_v3, %v228_v4  ;;  %s432_s3 = smov 48   ;;  %v392_v12 = vld [vmem:[%s736_s0 + $0x4] ss:$16 sm:%s261_s2]   ;;  %s264_s6 = smov 12 }
  0x1c   :  { %v245_v8 = vsel %vm6_vm0, %v389_v6, %v388_v5  ;;  %v390_v9 = vld [vmem:[%s736_s0 + $0x5] ss:$16 sm:%s247_s25]   ;;  %234 = vrot.lane.b32.xlu1 %v233_v7, %s432_s3  ;;  %s269_s7 = smov 48  ;;  %s274_s12 = smov 192 }
  0x1d   :  { %v391_v10 = vld [vmem:[%s736_s0 + $0x5] ss:$16 sm:%s252_s26]   ;;  %v250_v11 = vsel %vm10_vm1, %v390_v9, %v245_v8  ;;  %v393_v14 = vld [vmem:[%s736_s0 + $0x4] ss:$16 sm:%s264_s6]   ;;  %s433_s13 = smov 40   ;;  %s283_s16 = smov 3 }
  0x1e   :  { %v255_v13 = vsel %vm14_vm2, %v391_v10, %v250_v11  ;;  %v394_v15 = vld [vmem:[%s736_s0 + $0x4] ss:$16 sm:%s269_s7]   ;;  %v267_v16 = vsel %vm6_vm0, %v393_v14, %v392_v12  ;;  %s286_s17 = smov 12  ;;  %v396_v19 = vld [vmem:[%s736_s0 + $0x3] ss:$16 sm:%s283_s16]   ;;  %s291_s22 = smov 48 }
  0x1f   :  { %256 = vrot.lane.b32.xlu0 %v255_v13, %s433_s13  ;;  %v395_v17 = vld [vmem:[%s736_s0 + $0x4] ss:$16 sm:%s274_s12]   ;;  %v272_v18 = vsel %vm10_vm1, %v394_v15, %v267_v16  ;;  %s296_s23 = smov 192  ;;  %s305_s28 = smov 3 }
  0x20   :  { %v397_v20 = vld [vmem:[%s736_s0 + $0x3] ss:$16 sm:%s286_s17]   ;;  %v277_v21 = vsel %vm14_vm2, %v395_v17, %v272_v18  ;;  %s434_s29 = smov 32   ;;  %v400_v26 = vld [vmem:[%s736_s0 + $0x2] ss:$16 sm:%s305_s28]   ;;  %s308_s3 = smov 12 }
  0x21   :  { %v289_v22 = vsel %vm6_vm0, %v397_v20, %v396_v19  ;;  %v398_v23 = vld [vmem:[%s736_s0 + $0x3] ss:$16 sm:%s291_s22]   ;;  %278 = vrot.lane.b32.xlu1 %v277_v21, %s434_s29  ;;  %s313_s4 = smov 48  ;;  %s318_s9 = smov 192 }
  0x22   :  { %v399_v24 = vld [vmem:[%s736_s0 + $0x3] ss:$16 sm:%s296_s23]   ;;  %v294_v25 = vsel %vm10_vm1, %v398_v23, %v289_v22  ;;  %v401_v28 = vld [vmem:[%s736_s0 + $0x2] ss:$16 sm:%s308_s3]   ;;  %s435_s10 = smov 24   ;;  %s327_s13 = smov 3 }
  0x23   :  { %v299_v27 = vsel %vm14_vm2, %v399_v24, %v294_v25  ;;  %v402_v29 = vld [vmem:[%s736_s0 + $0x2] ss:$16 sm:%s313_s4]   ;;  %v311_v30 = vsel %vm6_vm0, %v401_v28, %v400_v26  ;;  %s330_s14 = smov 12  ;;  %v404_v33 = vld [vmem:[%s736_s0 + $0x1] ss:$16 sm:%s327_s13]   ;;  %s335_s19 = smov 48 }
  0x24   :  { %300 = vrot.lane.b32.xlu0 %v299_v27, %s435_s10  ;;  %v403_v31 = vld [vmem:[%s736_s0 + $0x2] ss:$16 sm:%s318_s9]   ;;  %v316_v32 = vsel %vm10_vm1, %v402_v29, %v311_v30  ;;  %s340_s20 = smov 192  ;;  %s2_s25 = smov 3 }
  0x25   :  { %v405_v34 = vld [vmem:[%s736_s0 + $0x1] ss:$16 sm:%s330_s14]   ;;  %v321_v35 = vsel %vm14_vm2, %v403_v31, %v316_v32  ;;  %s436_s26 = smov 16   ;;  %s4_s27 = smov 12  ;;  %v3_v40 = vld [vmem:[%s736_s0] ss:$16 sm:%s2_s25]  }
  0x26   :  { %v333_v36 = vsel %vm6_vm0, %v405_v34, %v404_v33  ;;  %v406_v37 = vld [vmem:[%s736_s0 + $0x1] ss:$16 sm:%s335_s19]   ;;  %322 = vrot.lane.b32.xlu1 %v321_v35, %s436_s26  ;;  %s8_s28 = smov 48  ;;  %s12_s2 = smov 192 }
  0x27   :  { %v407_v38 = vld [vmem:[%s736_s0 + $0x1] ss:$16 sm:%s340_s20]   ;;  %v338_v39 = vsel %vm10_vm1, %v406_v37, %v333_v36  ;;  %v5_v42 = vld [vmem:[%s736_s0] ss:$16 sm:%s4_s27]   ;;  %s437_s7 = smov 8  }
  0x28   :  { %v343_v41 = vsel %vm14_vm2, %v407_v38, %v338_v39  ;;  %v9_v43 = vld [vmem:[%s736_s0] ss:$16 sm:%s8_s28]   ;;  %v7_v44 = vsel %vm6_vm0, %v5_v42, %v3_v40  ;;  %vm302_vm0 = vcmask 261312  }
  0x29   :  { %344 = vrot.lane.b32.xlu0 %v343_v41, %s437_s7  ;;  %v13_v45 = vld [vmem:[%s736_s0] ss:$16 sm:%s12_s2]   ;;  %v11_v46 = vsel %vm10_vm1, %v9_v43, %v7_v44  ;;  %vm324_vm1 = vcmask 195712  }
  0x2a   :  { %v15_v47 = vsel %vm14_vm2, %v13_v45, %v11_v46  ;;  %vm346_vm2 = vcmask 130112  }
  0x2b   :  { %17 = vst.msk [vmem:[%s737_s1] sm:$0xff] %vm16_vm3, %v15_v47  }
  0x78   :  { %v37_v48 = vpop.permute.xlu0 %36  }
  0x79   :  { %39 = vst.msk [vmem:[%s737_s1] sm:$0xff] %vm38_vm4, %v37_v48  }
  0x7a   :  { %v81_v49 = vpop.permute.xlu1 %80  }
  0x7d   :  { %v59_v50 = vpop.permute.xlu0 %58  }
  0x7e   :  { %61 = vst.msk [vmem:[%s737_s1] sm:$0xff] %vm60_vm5, %v59_v50  }
  0x7f   :  { %83 = vst.msk [vmem:[%s737_s1] sm:$0xff] %vm82_vm6, %v81_v49   ;;  %v103_v51 = vpop.permute.xlu1 %102  }
  0x80   :  { %105 = vst.msk [vmem:[%s737_s1] sm:$0xff] %vm104_vm7, %v103_v51  }
  0x82   :  { %v125_v52 = vpop.permute.xlu0 %124  }
  0x83   :  { %127 = vst.msk [vmem:[%s737_s1] sm:$0xff] %vm126_vm8, %v125_v52  }
  0x84   :  { %v147_v53 = vpop.permute.xlu1 %146  }
  0x85   :  { %149 = vst.msk [vmem:[%s737_s1] sm:$0xff] %vm148_vm9, %v147_v53  }
  0x87   :  { %v169_v54 = vpop.permute.xlu0 %168  }
  0x88   :  { %171 = vst.msk [vmem:[%s737_s1] sm:$0xff] %vm170_vm10, %v169_v54  }
  0x89   :  { %v191_v55 = vpop.permute.xlu1 %190  }
  0x8a   :  { %193 = vst.msk [vmem:[%s737_s1] sm:$0xff] %vm192_vm11, %v191_v55  }
  0x8c   :  { %v213_v56 = vpop.permute.xlu0 %212  }
  0x8d   :  { %215 = vst.msk [vmem:[%s737_s1] sm:$0xff] %vm214_vm12, %v213_v56  }
  0x8e   :  { %v235_v57 = vpop.permute.xlu1 %234  }
  0x8f   :  { %237 = vst.msk [vmem:[%s737_s1] sm:$0xff] %vm236_vm13, %v235_v57  }
  0x91   :  { %v257_v58 = vpop.permute.xlu0 %256  }
  0x92   :  { %259 = vst.msk [vmem:[%s737_s1] sm:$0xff] %vm258_vm14, %v257_v58  }
  0x93   :  { %v279_v59 = vpop.permute.xlu1 %278  }
  0x94   :  { %281 = vst.msk [vmem:[%s737_s1] sm:$0xff] %vm280_vm15, %v279_v59  }
  0x96   :  { %v301_v60 = vpop.permute.xlu0 %300  }
  0x97   :  { %303 = vst.msk [vmem:[%s737_s1] sm:$0xff] %vm302_vm0, %v301_v60  }
  0x98   :  { %v323_v61 = vpop.permute.xlu1 %322  }
  0x99   :  { %325 = vst.msk [vmem:[%s737_s1] sm:$0xff] %vm324_vm1, %v323_v61  }
  0x9b   :  { %v345_v62 = vpop.permute.xlu0 %344  }
  0x9c   :  { %347 = vst.msk [vmem:[%s737_s1] sm:$0xff] %vm346_vm2, %v345_v62  }

// kernel: _forward_jit.1
= control target key start
LH: loop header
LB: loop body
LE: loop exit
PB: predicated region body
PF: predicated region fallthrough
CT: control target
= control target key end

     0   :  { %v590_v7 = vmov 0.0   ;;  %vm591_vm0 = vmmov 0   ;;  %vm261_vm9 = vcmask 64512   ;;  %vm437_vm10 = vcmask 7168   ;;  %s667_s0 = inlined_call_operand.vmem [shape: f32[8,128], index: 0, kind: input, shape index: {}]   ;;  %s668_s1 = inlined_call_operand.vmem [shape: f32[8,128], index: 1, kind: input, shape index: {}]   ;;  %s669_s3 = inlined_call_operand.vmem [shape: f32[8,128], index: 3, kind: output, shape index: {0}]   ;;  %s670_s2 = inlined_call_operand.vmem [shape: f32[8,1], index: 2, kind: input, shape index: {}]   ;;  %s671_s4 = inlined_call_operand.vmem [shape: f32[1,128], index: 4, kind: output, shape index: {1}]  }
   0x1   :  { %v16_v0 = vld [vmem:[%s667_s0] sm:$0xff]  ;;  %524 = vmatprep.subr.mxu0 %v590_v7  ;;  %529 = vmatprep.subr.mxu1 %v590_v7 }
   0x2   :  { %17 = vadd.xlane.f32.xlu0 %v16_v0  ;;  %v30_v1 = vld [vmem:[%s668_s1] sm:$0xff]  ;;  %526 = vmatprep.mubr.msk.f32.mxu0 %vm591_vm0, %v590_v7 }
   0x3   :  { %v174_v2 = vmul.f32 %v30_v1, %v30_v1  ;;  %530 = vmatpush3.xpose.msra.mxu1 %v30_v1  ;;  %531 = vmatprep.mubr.msk.f32.mxu1 %vm591_vm0, %v590_v7 }
   0x5   :  { %175 = vadd.xlane.f32.xlu1 %v174_v2 }
   0x6   :  { %532 = vmatmul.mubr.f32.vlgmr.msra.gmra.mxu1 %v30_v1 }
  0x8b   :  { %v18_v3 = vpop.xlane.xlu0 %17 }
  0x8c   :  { %v20_v4 = vmul.f32 0.0078125, %v18_v3 }
  0x8e   :  { %v21_v5 = vsub.f32 %v16_v0, %v20_v4  ;;  %v176_v54 = vpop.xlane.xlu1 %175 }
  0x90   :  { %v22_v6 = vmul.f32 %v21_v5, %v21_v5 }
  0x92   :  { %23 = vadd.xlane.f32.xlu0 %v22_v6 }
  0xc6   :  { %v167_v55 = vpop.f32.mrf.mxu1 }
  0xc8   :  { %v533_v56 = vpop.f32.mrf.mxu1 }
 0x11b   :  { %v24_v8 = vpop.xlane.xlu0 %23 }
 0x11c   :  { %v25_v9 = vmul.f32 0.0078125, %v24_v8 }
 0x11e   :  { %v26_v10 = vadd.f32 1e-05, %v25_v9 }
 0x120   :  { %544 = vrsqrt.f32 %v26_v10 }
 0x12d   :  { %v545_v11 = vpop.eup %544 }
 0x12e   :  { %v28_v12 = vmul.f32 %v545_v11, %v21_v5 }
 0x130   :  { %29 = vst [vmem:[%s669_s3] sm:$0xff] %v28_v12  ;;  %525 = vmatpush3.xpose.msra.mxu0 %v28_v12  ;;  %v171_v13 = vmul.f32 %v28_v12, %v28_v12  ;;  %v294_v14 = vrot.slane %v28_v12, 1  ;;  %v307_v15 = vrot.slane %v28_v12, 2  ;;  %v319_v16 = vrot.slane %v28_v12, 3 }
 0x131   :  { %v331_v17 = vrot.slane %v28_v12, 4 }
 0x132   :  { %172 = vadd.xlane.f32.xlu1 %v171_v13  ;;  %v302_v18 = vsub.f32 %v28_v12, %v294_v14  ;;  %v314_v19 = vsub.f32 %v28_v12, %v307_v15  ;;  %v326_v20 = vsub.f32 %v28_v12, %v319_v16 }
 0x133   :  { %527 = vmatmul.mubr.f32.vlgmr.msra.gmra.mxu0 %v28_v12  ;;  %v338_v21 = vsub.f32 %v28_v12, %v331_v17  ;;  %v209_v12 = vlaneseq }
 0x134   :  { %v303_v22 = vand.u32 2147483647, %v302_v18  ;;  %v315_v23 = vand.u32 2147483647, %v314_v19  ;;  %v327_v24 = vand.u32 2147483647, %v326_v20 }
 0x135   :  { %v339_v25 = vand.u32 2147483647, %v338_v21  ;;  %v632_v17 = vshrl.u32 %v209_v12, 7 }
 0x136   :  { %v349_v26 = vmax.f32 %v303_v22, 1e-30  ;;  %v350_v27 = vmax.f32 %v315_v23, 1e-30  ;;  %v351_v28 = vmax.f32 %v327_v24, 1e-30 }
 0x137   :  { %v352_v29 = vmax.f32 %v339_v25, 1e-30  ;;  %vm345_vm1 = vcmp.gt.f32.partialorder %v303_v22, 0.0  ;;  %vm346_vm2 = vcmp.gt.f32.partialorder %v315_v23, 0.0  ;;  %vm347_vm3 = vcmp.gt.f32.partialorder %v327_v24, 0.0 }
 0x138   :  { %546 = vlog2.f32 %v349_v26  ;;  %vm348_vm4 = vcmp.gt.f32.partialorder %v339_v25, 0.0  ;;  %v211_v21 = vsub.s32 0, %v632_v17  ;;  %v256_v24 = vmul.f32 2.0, %v167_v55 }
 0x139   :  { %548 = vlog2.f32 %v350_v27 }
 0x13a   :  { %550 = vlog2.f32 %v351_v28 }
 0x13b   :  { %552 = vlog2.f32 %v352_v29 }
 0x145   :  { %v547_v30 = vpop.eup %546 }
 0x146   :  { %v549_v31 = vpop.eup %548  ;;  %v354_v32 = vmul.f32 0.6931472, %v547_v30 }
 0x147   :  { %v551_v33 = vpop.eup %550  ;;  %v356_v34 = vmul.f32 0.6931472, %v549_v31 }
 0x148   :  { %v553_v35 = vpop.eup %552  ;;  %v361_v36 = vmul.f32 2.0001, %v354_v32  ;;  %v358_v37 = vmul.f32 0.6931472, %v551_v33 }
 0x149   :  { %v362_v38 = vmul.f32 2.0001, %v356_v34  ;;  %v360_v39 = vmul.f32 0.6931472, %v553_v35 }
 0x14a   :  { %v365_v40 = vmul.f32 1.442695, %v361_v36  ;;  %v363_v41 = vmul.f32 2.0001, %v358_v37 }
 0x14b   :  { %v367_v42 = vmul.f32 1.442695, %v362_v38  ;;  %v364_v43 = vmul.f32 2.0001, %v360_v39 }
 0x14c   :  { %554 = vpow2.f32 %v365_v40  ;;  %v369_v44 = vmul.f32 1.442695, %v363_v41 }
 0x14d   :  { %556 = vpow2.f32 %v367_v42  ;;  %v371_v45 = vmul.f32 1.442695, %v364_v43 }
 0x14e   :  { %558 = vpow2.f32 %v369_v44 }
 0x14f   :  { %560 = vpow2.f32 %v371_v45 }
 0x159   :  { %v555_v46 = vpop.eup %554 }
 0x15a   :  { %v557_v47 = vpop.eup %556  ;;  %v373_v48 = vsel %vm345_vm1, %v555_v46, 0.0 }
 0x15b   :  { %377 = vadd.xlane.f32.xlu0 %v373_v48  ;;  %v374_v49 = vsel %vm346_vm2, %v557_v47, 0.0  ;;  %v559_v50 = vpop.eup %558  ;;  %v291_v48 = vld [vmem:[%s670_s2] sm:$0xff] }
 0x15c   :  { %379 = vadd.xlane.f32.xlu1 %v374_v49  ;;  %v375_v51 = vsel %vm347_vm3, %v559_v50, 0.0  ;;  %v561_v52 = vpop.eup %560  ;;  %v299_v50 = vrot.slane %v291_v48, 1  ;;  %v292_v55 = vsub.f32 1.0, %v291_v48 }
 0x15d   :  { %v376_v53 = vsel %vm348_vm4, %v561_v52, 0.0 }
 0x15e   :  { %v305_v56 = vsub.f32 1.0, %v299_v50 }
 0x160   :  { %381 = vadd.xlane.f32.xlu1 %v375_v51  ;;  %v335_v51 = vrot.slane %v291_v48, 4 }
 0x164   :  { %383 = vadd.xlane.f32.xlu1 %v376_v53  ;;  %v311_v53 = vrot.slane %v291_v48, 2 }
 0x188   :  { %219 = vxpose.xlu0.b32.start.end [1/1] (short) (narrow) %v176_v54, 8 }
 0x1bb   :  { %v626_v57 = vpop.xlane.xlu1 %172 }
 0x1bc   :  { %177 = vxpose.xlu1.b32.start.end [1/1] (short) (narrow) %v626_v57, 8 }
 0x1e4   :  { %v378_v58 = vpop.xlane.xlu0 %377 }
 0x1e5   :  { %v389_v59 = vmax.f32 %v378_v58, 1e-30  ;;  %v380_v60 = vpop.xlane.xlu1 %379  ;;  %vm385_vm5 = vcmp.gt.f32.partialorder %v378_v58, 0.0  ;;  %v342_v58 = vsub.f32 1.0, %v335_v51 }
 0x1e6   :  { %v390_v61 = vmax.f32 %v380_v60, 1e-30  ;;  %vm386_vm6 = vcmp.gt.f32.partialorder %v380_v60, 0.0  ;;  %v316_v60 = vmul.f32 %v311_v53, %v291_v48 }
 0x1e7   :  { %562 = vlog2.f32 %v389_v59  ;;  %v304_v59 = vmul.f32 %v299_v50, %v291_v48 }
 0x1e8   :  { %564 = vlog2.f32 %v390_v61  ;;  %v317_v61 = vsub.f32 1.0, %v311_v53 }
 0x1e9   :  { %v382_v62 = vpop.xlane.xlu1 %381 }
 0x1ea   :  { %v391_v63 = vmax.f32 %v382_v62, 1e-30  ;;  %vm387_vm7 = vcmp.gt.f32.partialorder %v382_v62, 0.0 }
 0x1ec   :  { %566 = vlog2.f32 %v391_v63 }
 0x1ed   :  { %v384_v0 = vpop.xlane.xlu1 %383 }
 0x1ee   :  { %v392_v1 = vmax.f32 %v384_v0, 1e-30  ;;  %vm388_vm8 = vcmp.gt.f32.partialorder %v384_v0, 0.0 }
 0x1f0   :  { %568 = vlog2.f32 %v392_v1 }
 0x1f3   :  { %v629_v2 = vpop.f32.mrf.mxu0 }
 0x1f4   :  { %v563_v3 = vpop.eup %562 }
 0x1f5   :  { %v565_v4 = vpop.eup %564  ;;  %v394_v5 = vmul.f32 0.6931472, %v563_v3  ;;  %v528_v6 = vpop.f32.mrf.mxu0 }
 0x1f6   :  { %v396_v7 = vmul.f32 0.6931472, %v565_v4  ;;  %v340_v4 = vmul.f32 %v335_v51, %v291_v48  ;;  %v343_v6 = vmul.f32 %v342_v58, %v292_v55 }
 0x1f7   :  { %v401_v8 = vmul.f32 0.499975, %v394_v5  ;;  %v306_v5 = vmul.f32 %v305_v56, %v292_v55 }
 0x1f8   :  { %v402_v9 = vmul.f32 0.499975, %v396_v7 }
 0x1f9   :  { %v567_v10 = vpop.eup %566  ;;  %v405_v11 = vmul.f32 1.442695, %v401_v8 }
 0x1fa   :  { %v407_v13 = vmul.f32 1.442695, %v402_v9  ;;  %v398_v14 = vmul.f32 0.6931472, %v567_v10  ;;  %v318_v10 = vmul.f32 %v317_v61, %v292_v55 }
 0x1fb   :  { %570 = vpow2.f32 %v405_v11 }
 0x1fc   :  { %572 = vpow2.f32 %v407_v13  ;;  %v403_v15 = vmul.f32 0.499975, %v398_v14  ;;  %v341_v14 = vmul.f32 0.5, %v340_v4 }
 0x1fd   :  { %v569_v16 = vpop.eup %568 }
 0x1fe   :  { %v409_v18 = vmul.f32 1.442695, %v403_v15  ;;  %v400_v19 = vmul.f32 0.6931472, %v569_v16  ;;  %v344_v15 = vmul.f32 0.5, %v343_v6 }
 0x200   :  { %574 = vpow2.f32 %v409_v18  ;;  %v404_v20 = vmul.f32 0.499975, %v400_v19 }
 0x202   :  { %v411_v22 = vmul.f32 1.442695, %v404_v20 }
 0x204   :  { %576 = vpow2.f32 %v411_v22  ;;  %v235_v23 = vpop.trf.xlu0 }
 0x205   :  { %v254_v25 = vrot.slane %v235_v23, %v211_v21 }
 0x207   :  { %v255_v26 = vadd.f32 %v254_v25, %v176_v54  ;;  %v323_v54 = vrot.slane %v291_v48, 3 }
 0x208   :  { %v571_v27 = vpop.eup %570 }
 0x209   :  { %v573_v28 = vpop.eup %572  ;;  %v413_v29 = vsel %vm385_vm5, %v571_v27, 0.0  ;;  %v257_v30 = vsub.f32 %v255_v26, %v256_v24  ;;  %v329_v1 = vsub.f32 1.0, %v323_v54  ;;  %v328_v7 = vmul.f32 %v323_v54, %v291_v48 }
 0x20a   :  { %v417_v31 = vsub.f32 0.0, %v413_v29  ;;  %v414_v32 = vsel %vm386_vm6, %v573_v28, 0.0 }
 0x20b   :  { %v418_v33 = vsub.f32 0.0, %v414_v32  ;;  %v258_v34 = vmul.f32 -0.5, %v257_v30  ;;  %v330_v11 = vmul.f32 %v329_v1, %v292_v55 }
 0x20c   :  { %v421_v35 = vmul.f32 3.1622777, %v417_v31 }
 0x20d   :  { %v575_v36 = vpop.eup %574  ;;  %v422_v37 = vmul.f32 3.1622777, %v418_v33  ;;  %v259_v38 = vmul.f32 1.442695, %v258_v34 }
 0x20e   :  { %v425_v39 = vmul.f32 1.442695, %v421_v35  ;;  %v415_v40 = vsel %vm387_vm7, %v575_v36, 0.0 }
 0x20f   :  { %v427_v41 = vmul.f32 1.442695, %v422_v37  ;;  %v419_v42 = vsub.f32 0.0, %v415_v40  ;;  %578 = vpow2.f32 %v259_v38 }
 0x210   :  { %580 = vpow2.f32 %v425_v39 }
 0x211   :  { %v577_v43 = vpop.eup %576  ;;  %582 = vpow2.f32 %v427_v41  ;;  %v423_v44 = vmul.f32 3.1622777, %v419_v42 }
 0x212   :  { %v416_v45 = vsel %vm388_vm8, %v577_v43, 0.0 }
 0x213   :  { %v429_v46 = vmul.f32 1.442695, %v423_v44  ;;  %v420_v47 = vsub.f32 0.0, %v416_v45 }
 0x215   :  { %584 = vpow2.f32 %v429_v46  ;;  %v424_v49 = vmul.f32 3.1622777, %v420_v47 }
 0x217   :  { %v431_v52 = vmul.f32 1.442695, %v424_v49  ;;  %v214_v49 = vmul.f32 2.0, %v629_v2 }
 0x219   :  { %586 = vpow2.f32 %v431_v52 }
 0x21c   :  { %v640_v62 = vpop.eup %578 }
 0x21d   :  { %v581_v63 = vpop.eup %580  ;;  %v272_v0 = vsel %vm261_vm9, %v640_v62, 0.0 }
 0x21e   :  { %v583_v3 = vpop.eup %582  ;;  %273 = vadd.xlane.f32.xlu0 %v272_v0  ;;  %v433_v8 = vmul.f32 %v581_v63, %v304_v59  ;;  %v455_v16 = vmul.f32 %v581_v63, %v306_v5  ;;  %v477_v38 = vsel %vm437_vm10, %v581_v63, 0.0 }
 0x21f   :  { %v434_v9 = vmul.f32 %v583_v3, %v316_v60  ;;  %v456_v22 = vmul.f32 %v583_v3, %v318_v10  ;;  %v478_v39 = vsel %vm437_vm10, %v583_v3, 0.0 }
 0x220   :  { %v438_v19 = vsel %vm437_vm10, %v433_v8, 0.0  ;;  %v459_v29 = vsel %vm437_vm10, %v455_v16, 0.0  ;;  %v479_v43 = vadd.f32 %v478_v39, %v477_v38 }
 0x221   :  { %v439_v20 = vsel %vm437_vm10, %v434_v9, 0.0  ;;  %v460_v30 = vsel %vm437_vm10, %v456_v22, 0.0 }
 0x222   :  { %v585_v13 = vpop.eup %584  ;;  %v440_v26 = vadd.f32 %v439_v20, %v438_v19  ;;  %v461_v35 = vadd.f32 %v460_v30, %v459_v29 }
 0x223   :  { %v435_v18 = vmul.f32 %v585_v13, %v328_v7  ;;  %v457_v24 = vmul.f32 %v585_v13, %v330_v11  ;;  %v480_v41 = vsel %vm437_vm10, %v585_v13, 0.0 }
 0x224   :  { %v481_v45 = vadd.f32 %v480_v41, %v479_v43 }
 0x225   :  { %v441_v23 = vsel %vm437_vm10, %v435_v18, 0.0  ;;  %v462_v33 = vsel %vm437_vm10, %v457_v24, 0.0 }
 0x226   :  { %v587_v25 = vpop.eup %586  ;;  %v442_v31 = vadd.f32 %v441_v23, %v440_v26  ;;  %v463_v40 = vadd.f32 %v462_v33, %v461_v35 }
 0x227   :  { %v436_v27 = vmul.f32 %v587_v25, %v341_v14  ;;  %v458_v28 = vmul.f32 %v587_v25, %v344_v15  ;;  %v476_v37 = vmul.f32 0.5, %v587_v25 }
 0x229   :  { %v443_v32 = vsel %vm437_vm10, %v436_v27, 0.0  ;;  %v464_v36 = vsel %vm437_vm10, %v458_v28, 0.0  ;;  %v482_v44 = vsel %vm437_vm10, %v476_v37, 0.0 }
 0x22a   :  { %v444_v34 = vadd.f32 %v443_v32, %v442_v31  ;;  %v465_v42 = vadd.f32 %v464_v36, %v463_v40  ;;  %v483_v46 = vadd.f32 %v482_v44, %v481_v45  ;;  %v505_v44 = vand.u32 127, %v209_v12 }
 0x22c   :  { %445 = vadd.xlane.f32.xlu0 %v444_v34  ;;  %vm506_vm11 = vcmp.eq.s32.totalorder %v505_v44, 0  ;;  %vm508_vm12 = vcmp.eq.s32.totalorder %v505_v44, 1 }
 0x230   :  { %466 = vadd.xlane.f32.xlu0 %v465_v42 }
 0x234   :  { %484 = vadd.xlane.f32.xlu0 %v483_v46 }
 0x238   :  { %v193_v47 = vpop.trf.xlu1 }
 0x239   :  { %v212_v48 = vrot.slane %v193_v47, %v211_v21 }
 0x23b   :  { %v213_v50 = vadd.f32 %v212_v48, %v626_v57 }
 0x23d   :  { %v215_v51 = vsub.f32 %v213_v50, %v214_v49 }
 0x23f   :  { %v216_v52 = vmul.f32 -0.5, %v215_v51 }
 0x241   :  { %v217_v53 = vmul.f32 1.442695, %v216_v52 }
 0x243   :  { %588 = vpow2.f32 %v217_v53 }
 0x250   :  { %v589_v54 = vpop.eup %588 }
 0x251   :  { %v262_v55 = vsel %vm261_vm9, %v589_v54, 0.0 }
 0x252   :  { %v263_v56 = vrot.slane %v262_v55, 4 }
 0x254   :  { %v264_v58 = vadd.f32 %v263_v56, %v262_v55 }
 0x256   :  { %v265_v59 = vrot.slane %v264_v58, 2 }
 0x258   :  { %v266_v60 = vadd.f32 %v265_v59, %v264_v58 }
 0x25a   :  { %v267_v61 = vrot.slane %v266_v60, 1 }
 0x25c   :  { %v268_v63 = vadd.f32 %v267_v61, %v266_v60 }
 0x25e   :  { %v270_v0 = vmul.f32 0.125, %v268_v63 }
 0x260   :  { %v271_v1 = vsub.f32 %v589_v54, %v270_v0 }
 0x2a7   :  { %v274_v17 = vpop.xlane.xlu0 %273 }
 0x2a8   :  { %v275_v21 = vmul.f32 0.125, %v274_v17 }
 0x2aa   :  { %v276_v2 = vsub.f32 %v640_v62, %v275_v21 }
 0x2ac   :  { %v277_v57 = vmul.f32 %v276_v2, %v271_v1 }
 0x2ae   :  { %v278_v3 = vsel %vm261_vm9, %v277_v57, 0.0 }
 0x2af   :  { %279 = vadd.xlane.f32.xlu1 %v278_v3 }
 0x2b5   :  { %v446_v4 = vpop.xlane.xlu0 %445 }
 0x2b6   :  { %v447_v7 = vrot.slane %v446_v4, 4 }
 0x2b8   :  { %v448_v10 = vadd.f32 %v447_v7, %v446_v4 }
 0x2b9   :  { %v467_v5 = vpop.xlane.xlu0 %466 }
 0x2ba   :  { %v468_v8 = vrot.slane %v467_v5, 4  ;;  %v449_v14 = vrot.slane %v448_v10, 2 }
 0x2bc   :  { %v469_v11 = vadd.f32 %v468_v8, %v467_v5  ;;  %v450_v20 = vadd.f32 %v449_v14, %v448_v10 }
 0x2bd   :  { %v485_v6 = vpop.xlane.xlu0 %484 }
 0x2be   :  { %v486_v9 = vrot.slane %v485_v6, 4  ;;  %v470_v16 = vrot.slane %v469_v11, 2  ;;  %v451_v26 = vrot.slane %v450_v20, 1 }
 0x2c0   :  { %v487_v13 = vadd.f32 %v486_v9, %v485_v6  ;;  %v471_v23 = vadd.f32 %v470_v16, %v469_v11  ;;  %v452_v31 = vadd.f32 %v451_v26, %v450_v20 }
 0x2c2   :  { %v488_v19 = vrot.slane %v487_v13, 2  ;;  %v472_v28 = vrot.slane %v471_v23, 1 }
 0x2c4   :  { %v489_v24 = vadd.f32 %v488_v19, %v487_v13  ;;  %v473_v32 = vadd.f32 %v472_v28, %v471_v23 }
 0x2c6   :  { %v490_v29 = vrot.slane %v489_v24, 1 }
 0x2c8   :  { %v491_v33 = vadd.f32 %v490_v29, %v489_v24 }
 0x338   :  { %v280_v15 = vpop.xlane.xlu1 %279 }
 0x339   :  { %v281_v18 = vrot.slane %v280_v15, 4 }
 0x33b   :  { %v282_v62 = vadd.f32 %v281_v18, %v280_v15 }
 0x33d   :  { %v283_v22 = vrot.slane %v282_v62, 2 }
 0x33f   :  { %v284_v25 = vadd.f32 %v283_v22, %v282_v62 }
 0x341   :  { %v285_v27 = vrot.slane %v284_v25, 1 }
 0x343   :  { %v286_v30 = vadd.f32 %v285_v27, %v284_v25 }
 0x345   :  { %534 = vpush %v286_v30 }
 0x346   :  { %536 = vpush %v452_v31 }
 0x347   :  { %538 = vpush %v473_v32 }
 0x348   :  { %540 = vpush %v491_v33 }
 0x376   :  { %s535_s2 = spop %534 }
 0x377   :  { %s537_s20 = spop %536  ;;  %v288_v43 = vstv %s535_s2 }
 0x378   :  { %v454_v34 = vstv %s537_s20  ;;  %s539_s21 = spop %538  ;;  %v290_v47 = vmul.f32 0.020408163, %v288_v43 }
 0x379   :  { %v496_v35 = vmul.f32 2.0, %v454_v34  ;;  %v475_v36 = vstv %s539_s21  ;;  %s541_s22 = spop %540 }
 0x37a   :  { %v498_v37 = vmul.f32 2.0, %v475_v36  ;;  %v493_v38 = vstv %s541_s22  ;;  %v507_v50 = vsel %vm506_vm11, %v290_v47, 0.0 }
 0x37b   :  { %v497_v39 = vmul.f32 0.0, %v496_v35  ;;  %v494_v40 = vsub.f32 %v493_v38, %v454_v34 }
 0x37c   :  { %v499_v41 = vmul.f32 0.0625, %v498_v37 }
 0x37d   :  { %v495_v42 = vsub.f32 %v494_v40, %v475_v36 }
 0x37e   :  { %v500_v45 = vadd.f32 %v499_v41, %v497_v39 }
 0x37f   :  { %v501_v46 = vmul.f32 -0.0, %v495_v42 }
 0x381   :  { %v502_v48 = vsub.f32 %v500_v45, %v501_v46 }
 0x383   :  { %v503_v49 = vmul.f32 4.0, %v502_v48 }
 0x385   :  { %v509_v51 = vsel %vm508_vm12, %v503_v49, 0.0 }
 0x386   :  { %v510_v52 = vadd.f32 %v509_v51, %v507_v50 }
 0x388   :  { %511 = vst [vmem:[%s671_s4] sm:$0x1] %v510_v52 }

</bundles_post_ra>
